<compile_context>
chip_gen: v7x
topology: tpu7x:2x2x1
jax: 0.10.0
libtpu: 0.0.40
codegen_flags: <defaults>
</compile_context>

<pallas_src>
import functools

import jax
import jax.numpy as jnp
import numpy as np
from jax import lax
from jax.experimental import pallas as pl
from jax.experimental.pallas import tpu as pltpu


def _round_up(x, m):
    return ((x + m - 1) // m) * m


def _tile_presets():
    """Per-generation (tm, tv, vmem_limit) presets keyed off per-core VMEM."""
    vmem = None
    try:
        vmem = pltpu.get_tpu_info().vmem_capacity_bytes
    except Exception:
        pass
    if vmem is None:
        return 512, 512, 40 * 1024 * 1024           # conservative fallback
    if vmem >= 96 * 1024 * 1024:                     # v5e / v6e: 128 MiB per core
        return 1024, 1024, 96 * 1024 * 1024
    return 1024, 512, 44 * 1024 * 1024               # v7x: 64 MiB per core


def _fit_tiles(H, tm, tv, vmem_limit):
    """Shrink tm / tv until the estimated VMEM footprint fits the budget."""
    def usage(tm_, tv_):
        x_bytes = 2 * (H * tm_ * 2)          # bf16 hidden tile, double-buffered
        w_bytes = 2 * (tv_ * H * 2)          # bf16 W tile, double-buffered
        b_bytes = 2 * (tv_ * 128 * 4)        # bias, lane-padded to 128
        tmp = 3 * (tv_ * tm_ * 4)            # logits + full-tile f32 temporaries
        out = 8 * (8 * tm_ * 4)              # [1,tm] outputs / scratch (padded rows)
        return x_bytes + w_bytes + b_bytes + tmp + out
    while tm > 256 and usage(tm, tv) > 0.8 * vmem_limit:
        tm //= 2
    while tv > 128 and usage(tm, tv) > 0.8 * vmem_limit:
        tv //= 2
    return tm, tv


# -----------------------------------------------------------------------------
# Pallas kernel: fused output projection + online LSE (+ argmax)
# -----------------------------------------------------------------------------
def _loss_kernel(x_ref, w_ref, b_ref, tgt_ref, *refs, vt, with_preds):
    # x_ref   : [H,  tm]  bf16   hidden-state tile, tokens on lanes (resident across vocab)
    # w_ref   : [Vt, H ]  bf16   vocab tile of the output projection (temperature pre-folded)
    # b_ref   : [Vt, 1 ]  f32    bias (temperature pre-folded)
    # tgt_ref : [1,  tm]  int32  target token ids
    # outputs : nll [1, tm] f32  (+ pred [1, tm] int32 if with_preds)
    # scratch : m, l, tgt_logit [1, tm] f32 (+ argmax idx [1, tm] int32)
    if with_preds:
        nll_ref, pred_ref, m_scr, l_scr, t_scr, ai_scr = refs
    else:
        nll_ref, m_scr, l_scr, t_scr = refs

    j = pl.program_id(1)                      # vocab-tile index (innermost axis)

    @pl.when(j == 0)
    def _init():
        m_scr[...] = jnp.full(m_scr.shape, -1e30, jnp.float32)
        l_scr[...] = jnp.zeros(l_scr.shape, jnp.float32)
        t_scr[...] = jnp.zeros(t_scr.shape, jnp.float32)
        if with_preds:
            ai_scr[...] = jnp.zeros(ai_scr.shape, jnp.int32)

    # [Vt, tm] transposed logits tile: bf16 MXU inputs, f32 accumulation.
    logits = jnp.dot(w_ref[...], x_ref[...], preferred_element_type=jnp.float32)
    logits = logits + b_ref[...]

    # Online logsumexp across vocab tiles (sublane reductions -> [1, tm] rows).
    tile_max = jnp.max(logits, axis=0, keepdims=True)
    m_prev = m_scr[...]
    m_new = jnp.maximum(m_prev, tile_max)
    l_scr[...] = l_scr[...] * jnp.exp(m_prev - m_new) + jnp.sum(
        jnp.exp(logits - m_new), axis=0, keepdims=True)
    m_scr[...] = m_new

    # Target logit: LOCAL iota vs. a shifted [1, tm] target row (no full-tile
    # int32 add), select + sum along sublanes.
    local_ids = lax.broadcasted_iota(jnp.int32, logits.shape, 0)
    tgt_local = tgt_ref[...] - j * vt
    t_scr[...] += jnp.sum(jnp.where(local_ids == tgt_local, logits, 0.0),
                          axis=0, keepdims=True)

    if with_preds:
        # Running argmax (first-occurrence tie-break).  The running max value
        # is m_prev / m_scr, shared with the LSE path (no separate av_scr).
        big = jnp.iinfo(jnp.int32).max
        tile_arg = jnp.min(jnp.where(logits == tile_max, local_ids, big),
                           axis=0, keepdims=True) + j * vt
        better = tile_max > m_prev
        ai_scr[...] = jnp.where(better, tile_arg, ai_scr[...])

    @pl.when(j == pl.num_programs(1) - 1)
    def _finalize():
        nll_ref[...] = m_scr[...] + jnp.log(l_scr[...]) - t_scr[...]
        if with_preds:
            pred_ref[...] = ai_scr[...]


def fused_lm_loss(hidden_t, w_out, b_out, targets, *, temperature,
                  with_preds=True, tm=None, tv=None):
    """Fused output projection + per-token NLL (+ greedy preds).

    hidden_t : [H, N] float   hidden states, tokens on the trailing (lane) axis
    w_out    : [V, H] float   nn.Linear-style [out_features, in_features]
    b_out    : [V]    float
    targets  : [N]    int
    """
    H, N = hidden_t.shape
    V, H2 = w_out.shape
    assert H == H2

    preset_tm, preset_tv, vmem_limit = _tile_presets()
    tm = preset_tm if tm is None else tm
    tv = preset_tv if tv is None else tv
    tm, tv = _fit_tiles(H, tm, tv, vmem_limit)

    # Token tiling: large lane-dense tiles (AI of the W stream == tm FLOP/byte),
    # but keep >=2 token tiles when possible so the 'parallel' axis can feed
    # both v7x TensorCores.
    n128 = _round_up(N, 128)
    tm = min(tm, n128)
    if tm > 256 and n128 // tm < 2:
        tm = max(256, (n128 // 2) // 256 * 256)
    n_pad = _round_up(N, tm)

    # Vocab tiling: online-LSE tiles; tv only sets the W buffer footprint.
    tv = min(tv, _round_up(V, 128))
    v_pad = _round_up(V, tv)

    # Temperature folded into W / b in glue (scalar fused into the cast):
    # no full-tile multiply in the kernel and no recompile per temperature.
    inv_temp = 1.0 / jnp.asarray(temperature, jnp.float32)
    x = hidden_t.astype(jnp.bfloat16)
    w = (w_out.astype(jnp.float32) * inv_temp).astype(jnp.bfloat16)
    b = b_out.astype(jnp.float32) * inv_temp
    tgt = targets.astype(jnp.int32)
    if n_pad != N:
        x = jnp.pad(x, ((0, 0), (0, n_pad - N)))
        tgt = jnp.pad(tgt, (0, n_pad - N), constant_values=-1)   # never matches iota
    if v_pad != V:
        w = jnp.pad(w, ((0, v_pad - V), (0, 0)))
        b = jnp.pad(b, (0, v_pad - V), constant_values=-1e30)    # never wins max/sum/argmax
    b = b.reshape(v_pad, 1)
    tgt = tgt.reshape(1, n_pad)

    kernel = functools.partial(_loss_kernel, vt=tv, with_preds=with_preds)

    out_shape = [jax.ShapeDtypeStruct((1, n_pad), jnp.float32)]
    out_specs = [pl.BlockSpec((1, tm), lambda i, j: (0, i))]
    scratch = [pltpu.VMEM((1, tm), jnp.float32),   # m (running max, shared with argmax)
               pltpu.VMEM((1, tm), jnp.float32),   # l (running sum-exp)
               pltpu.VMEM((1, tm), jnp.float32)]   # target logit
    if with_preds:
        out_shape.append(jax.ShapeDtypeStruct((1, n_pad), jnp.int32))
        out_specs.append(pl.BlockSpec((1, tm), lambda i, j: (0, i)))
        scratch.append(pltpu.VMEM((1, tm), jnp.int32))   # running argmax index

    cost = pl.CostEstimate(
        flops=2 * n_pad * v_pad * H,
        transcendentals=n_pad * v_pad,
        bytes_accessed=v_pad * H * 2 * (n_pad // tm) + n_pad * H * 2
                       + n_pad * 4 * (2 if with_preds else 1))

    outs = pl.pallas_call(
        kernel,
        out_shape=tuple(out_shape),
        grid_spec=pltpu.PrefetchScalarGridSpec(
            num_scalar_prefetch=0,
            grid=(n_pad // tm, v_pad // tv),            # (tokens, vocab); vocab innermost
            in_specs=[
                pl.BlockSpec((H, tm), lambda i, j: (0, i)),    # hidden (resident over vocab)
                pl.BlockSpec((tv, H), lambda i, j: (j, 0)),    # W      (per vocab tile)
                pl.BlockSpec((tv, 1), lambda i, j: (j, 0)),    # bias
                pl.BlockSpec((1, tm), lambda i, j: (0, i)),    # targets
            ],
            out_specs=tuple(out_specs),
            scratch_shapes=scratch,
        ),
        compiler_params=pltpu.CompilerParams(
            dimension_semantics=("parallel", "arbitrary"),
            vmem_limit_bytes=vmem_limit,
        ),
        cost_estimate=cost,
    )(x, w, b, tgt)

    nll = outs[0][0, :N]
    preds = outs[1][0, :N] if with_preds else None
    return nll, preds


# -----------------------------------------------------------------------------
# Concrete LossWrapper (JAX side), mirroring AbstractLossWrapper.forward
# -----------------------------------------------------------------------------
class LossWrapper:
    def __init__(self, vocab_size=128, hidden=32, seed=0):
        self.vocab_size = vocab_size
        self.hidden = hidden
        k_emb, k_w, k_b = jax.random.split(jax.random.PRNGKey(seed), 3)
        self.embed = 0.02 * jax.random.normal(k_emb, (vocab_size, hidden), jnp.float32)
        # nn.Linear layout: [out_features, in_features]
        self.w_out = 0.02 * jax.random.normal(k_w, (vocab_size, hidden), jnp.float32)
        self.b_out = 0.02 * jax.random.normal(k_b, (vocab_size,), jnp.float32)

    def forward(self, data, seq_len, ret_preds, tforce, gen_targs, gen_ids,
                no_grad, kl_scale, temperature, top_k):
        # TODO(synk): non-teacher-forced decode (tforce=False), gen_targs /
        # gen_ids / top_k sampling and the kl_scale auxiliary term have no
        # defined semantics in the abstract base class and are not faked here.
        input_ids = data["input_ids"][:, :seq_len]      # [B, S] int32
        target_ids = data["output_ids"][:, :seq_len]    # [B, S] int32
        B, S = input_ids.shape

        # Glue: embedding gather, then tokens-on-lanes layout [H, N].
        # TODO(synk): optionally fuse this gather into the kernel (scalar
        # prefetch + pl.Element row index_map) to skip one HBM round trip.
        hidden_t = jnp.take(self.embed, input_ids.reshape(-1), axis=0).T
        targets = target_ids.reshape(-1)

        nll, preds = fused_lm_loss(
            hidden_t, self.w_out, self.b_out, targets,
            temperature=temperature, with_preds=ret_preds)

        # Ignore-index / padding masking (PyTorch ignore_index=-100 style):
        # tokens with targets outside [0, V) are excluded from the mean loss.
        valid = (targets >= 0) & (targets < self.vocab_size)
        nll = jnp.where(valid, nll, 0.0)
        denom = jnp.maximum(jnp.sum(valid.astype(jnp.float32)), 1.0)
        loss = jnp.sum(nll) / denom

        out = {"loss": loss, "nll": nll.reshape(B, S)}
        if ret_preds:
            out["preds"] = preds.reshape(B, S)
        return out

    __call__ = forward


if __name__ == "__main__":
    B, S, H, V = 2, 8, 32, 128
    k_in, k_out = jax.random.split(jax.random.PRNGKey(0))
    data = {
        "input_ids": jax.random.randint(k_in, (B, S), 0, V, dtype=jnp.int32),
        "output_ids": jax.random.randint(k_out, (B, S), 0, V, dtype=jnp.int32),
    }

    wrapper = LossWrapper(vocab_size=V, hidden=H, seed=0)
    out = wrapper(
        data, seq_len=S, ret_preds=True, tforce=True, gen_targs=False,
        gen_ids=False, no_grad=False, kl_scale=0.0, temperature=1.0, top_k=None)
    jax.block_until_ready(out["loss"])

    # Pure-JAX reference using the same bf16 input rounding as the kernel.
    ids = data["input_ids"].reshape(-1)
    tgt = data["output_ids"].reshape(-1)
    x = jnp.take(wrapper.embed, ids, axis=0).astype(jnp.bfloat16).astype(jnp.float32)
    w = wrapper.w_out.astype(jnp.bfloat16).astype(jnp.float32)
    logits = (x @ w.T + wrapper.b_out) / 1.0
    m = jnp.max(logits, axis=-1, keepdims=True)
    lse = (m + jnp.log(jnp.sum(jnp.exp(logits - m), axis=-1, keepdims=True)))[:, 0]
    ref_nll = lse - jnp.take_along_axis(logits, tgt[:, None], axis=1)[:, 0]
    ref_pred = jnp.argmax(logits, axis=-1)

    np.testing.assert_allclose(np.asarray(out["nll"]).reshape(-1),
                               np.asarray(ref_nll), rtol=1e-2, atol=1e-2)
    np.testing.assert_allclose(float(out["loss"]), float(ref_nll.mean()),
                               rtol=1e-2, atol=1e-2)
    assert np.array_equal(np.asarray(out["preds"]).reshape(-1), np.asarray(ref_pred))
    print("KERNEL_OK")
</pallas_src>

<mosaic_0001>
module attributes {stable_mosaic.version = 11 : i64} {
  func.func @_loss_kernel(%arg0: i32, %arg1: i32, %arg2: memref<32x128xbf16, #tpu.memory_space<vmem>>, %arg3: memref<128x32xbf16, #tpu.memory_space<vmem>>, %arg4: memref<128x1xf32, #tpu.memory_space<vmem>>, %arg5: memref<1x128xi32, #tpu.memory_space<vmem>>, %arg6: memref<1x128xf32, #tpu.memory_space<vmem>>, %arg7: memref<1x128xi32, #tpu.memory_space<vmem>>, %arg8: memref<1x128xf32, #tpu.memory_space<vmem>>, %arg9: memref<1x128xf32, #tpu.memory_space<vmem>>, %arg10: memref<1x128xf32, #tpu.memory_space<vmem>>, %arg11: memref<1x128xi32, #tpu.memory_space<vmem>>) attributes {dimension_semantics = [#tpu.dimension_semantics<parallel>, #tpu.dimension_semantics<arbitrary>], iteration_bounds = array<i64: 1, 1>, scalar_prefetch = 0 : i64, scratch_operands = 4 : i64, tpu.core_type = #tpu.core_type<tc>, window_params = [{transform_indices = @transform_0, window_bounds = array<i64: 32, 128>}, {transform_indices = @transform_1, window_bounds = array<i64: 128, 32>}, {transform_indices = @transform_2, window_bounds = array<i64: 128, 1>}, {transform_indices = @transform_3, window_bounds = array<i64: 1, 128>}, {transform_indices = @transform_4, window_bounds = array<i64: 1, 128>}, {transform_indices = @transform_5, window_bounds = array<i64: 1, 128>}]} {
    %c0_i32 = arith.constant 0 : i32
    %0 = arith.cmpi eq, %arg1, %c0_i32 : i32
    %1 = arith.extui %0 : i1 to i32
    %c0_i32_0 = arith.constant 0 : i32
    %2 = arith.cmpi ne, %1, %c0_i32_0 : i32
    scf.if %2 {
      %cst_32 = arith.constant -1.000000e+30 : f32
      %55 = vector.broadcast %cst_32 : f32 to vector<1x128xf32>
      %c0_33 = arith.constant 0 : index
      %c0_34 = arith.constant 0 : index
      %56 = vector.load %arg8[%c0_33, %c0_34] : memref<1x128xf32, #tpu.memory_space<vmem>>, vector<1x128xf32>
      tpu.vector_store %arg8[%c0_33, %c0_34], %55 {strides = array<i32>} : memref<1x128xf32, #tpu.memory_space<vmem>>, vector<1x128xf32>,
      %cst_35 = arith.constant 0.000000e+00 : f32
      %57 = vector.broadcast %cst_35 : f32 to vector<1x128xf32>
      %c0_36 = arith.constant 0 : index
      %c0_37 = arith.constant 0 : index
      %58 = vector.load %arg9[%c0_36, %c0_37] : memref<1x128xf32, #tpu.memory_space<vmem>>, vector<1x128xf32>
      tpu.vector_store %arg9[%c0_36, %c0_37], %57 {strides = array<i32>} : memref<1x128xf32, #tpu.memory_space<vmem>>, vector<1x128xf32>,
      %cst_38 = arith.constant 0.000000e+00 : f32
      %59 = vector.broadcast %cst_38 : f32 to vector<1x128xf32>
      %c0_39 = arith.constant 0 : index
      %c0_40 = arith.constant 0 : index
      %60 = vector.load %arg10[%c0_39, %c0_40] : memref<1x128xf32, #tpu.memory_space<vmem>>, vector<1x128xf32>
      tpu.vector_store %arg10[%c0_39, %c0_40], %59 {strides = array<i32>} : memref<1x128xf32, #tpu.memory_space<vmem>>, vector<1x128xf32>,
      %c0_i32_41 = arith.constant 0 : i32
      %61 = vector.broadcast %c0_i32_41 : i32 to vector<1x128xi32>
      %c0_42 = arith.constant 0 : index
      %c0_43 = arith.constant 0 : index
      %62 = vector.load %arg11[%c0_42, %c0_43] : memref<1x128xi32, #tpu.memory_space<vmem>>, vector<1x128xi32>
      tpu.vector_store %arg11[%c0_42, %c0_43], %61 {strides = array<i32>} : memref<1x128xi32, #tpu.memory_space<vmem>>, vector<1x128xi32>,
    } else {
    }
    %c0 = arith.constant 0 : index
    %c0_1 = arith.constant 0 : index
    %3 = vector.load %arg3[%c0, %c0_1] : memref<128x32xbf16, #tpu.memory_space<vmem>>, vector<128x32xbf16>
    %c0_2 = arith.constant 0 : index
    %c0_3 = arith.constant 0 : index
    %4 = vector.load %arg2[%c0_2, %c0_3] : memref<32x128xbf16, #tpu.memory_space<vmem>>, vector<32x128xbf16>
    %cst = arith.constant dense<0.000000e+00> : vector<128x128xf32>
    %5 = tpu.matmul %3, %4, %cst {dimension_numbers = #tpu.dot_dimension_numbers<[1], [0], [0], [1], [0, 0, 1, 1], [], []>} : vector<128x32xbf16>, vector<32x128xbf16>, vector<128x128xf32> -> vector<128x128xf32>
    %c0_4 = arith.constant 0 : index
    %c0_5 = arith.constant 0 : index
    %6 = vector.load %arg4[%c0_4, %c0_5] : memref<128x1xf32, #tpu.memory_space<vmem>>, vector<128x1xf32>
    %7 = vector.broadcast %6 : vector<128x1xf32> to vector<128x128xf32>
    %8 = arith.addf %5, %7 : vector<128x128xf32>
    %cst_6 = arith.constant dense<0xFF800000> : vector<128xf32>
    %9 = vector.multi_reduction <maximumf>, %8, %cst_6 [0] : vector<128x128xf32> to vector<128xf32>
    %10 = vector.shape_cast %9 : vector<128xf32> to vector<1x128xf32>
    %c0_7 = arith.constant 0 : index
    %c0_8 = arith.constant 0 : index
    %11 = vector.load %arg8[%c0_7, %c0_8] : memref<1x128xf32, #tpu.memory_space<vmem>>, vector<1x128xf32>
    %12 = arith.maximumf %11, %10 : vector<1x128xf32>
    %c0_9 = arith.constant 0 : index
    %c0_10 = arith.constant 0 : index
    %13 = vector.load %arg9[%c0_9, %c0_10] : memref<1x128xf32, #tpu.memory_space<vmem>>, vector<1x128xf32>
    %14 = arith.subf %11, %12 : vector<1x128xf32>
    %15 = math.exp %14 : vector<1x128xf32>
    %16 = arith.mulf %13, %15 : vector<1x128xf32>
    %17 = vector.broadcast %12 : vector<1x128xf32> to vector<128x128xf32>
    %18 = arith.subf %8, %17 : vector<128x128xf32>
    %19 = math.exp %18 : vector<128x128xf32>
    %cst_11 = arith.constant dense<0.000000e+00> : vector<128xf32>
    %20 = vector.multi_reduction <add>, %19, %cst_11 [0] : vector<128x128xf32> to vector<128xf32>
    %21 = vector.shape_cast %20 : vector<128xf32> to vector<1x128xf32>
    %22 = arith.addf %16, %21 : vector<1x128xf32>
    %c0_12 = arith.constant 0 : index
    %c0_13 = arith.constant 0 : index
    %23 = vector.load %arg9[%c0_12, %c0_13] : memref<1x128xf32, #tpu.memory_space<vmem>>, vector<1x128xf32>
    tpu.vector_store %arg9[%c0_12, %c0_13], %22 {strides = array<i32>} : memref<1x128xf32, #tpu.memory_space<vmem>>, vector<1x128xf32>,
    %c0_14 = arith.constant 0 : index
    %c0_15 = arith.constant 0 : index
    %24 = vector.load %arg8[%c0_14, %c0_15] : memref<1x128xf32, #tpu.memory_space<vmem>>, vector<1x128xf32>
    tpu.vector_store %arg8[%c0_14, %c0_15], %12 {strides = array<i32>} : memref<1x128xf32, #tpu.memory_space<vmem>>, vector<1x128xf32>,
    %25 = tpu.iota {dimensions = array<i32: 0>} : vector<128x128xi32>
    %c0_16 = arith.constant 0 : index
    %c0_17 = arith.constant 0 : index
    %26 = vector.load %arg5[%c0_16, %c0_17] : memref<1x128xi32, #tpu.memory_space<vmem>>, vector<1x128xi32>
    %c128_i32 = arith.constant 128 : i32
    %27 = arith.muli %arg1, %c128_i32 : i32
    %28 = vector.broadcast %27 : i32 to vector<1x128xi32>
    %29 = arith.subi %26, %28 : vector<1x128xi32>
    %c0_18 = arith.constant 0 : index
    %c0_19 = arith.constant 0 : index
    %30 = vector.load %arg10[%c0_18, %c0_19] : memref<1x128xf32, #tpu.memory_space<vmem>>, vector<1x128xf32>
    %31 = vector.broadcast %29 : vector<1x128xi32> to vector<128x128xi32>
    %32 = arith.cmpi eq, %25, %31 : vector<128x128xi32>
    %cst_20 = arith.constant 0.000000e+00 : f32
    %33 = vector.broadcast %cst_20 : f32 to vector<128x128xf32>
    %34 = arith.select %32, %8, %33 : vector<128x128xi1>, vector<128x128xf32>
    %cst_21 = arith.constant dense<0.000000e+00> : vector<128xf32>
    %35 = vector.multi_reduction <add>, %34, %cst_21 [0] : vector<128x128xf32> to vector<128xf32>
    %36 = vector.shape_cast %35 : vector<128xf32> to vector<1x128xf32>
    %37 = arith.addf %30, %36 : vector<1x128xf32>
    %c0_22 = arith.constant 0 : index
    %c0_23 = arith.constant 0 : index
    %38 = vector.load %arg10[%c0_22, %c0_23] : memref<1x128xf32, #tpu.memory_space<vmem>>, vector<1x128xf32>
    tpu.vector_store %arg10[%c0_22, %c0_23], %37 {strides = array<i32>} : memref<1x128xf32, #tpu.memory_space<vmem>>, vector<1x128xf32>,
    %39 = vector.broadcast %10 : vector<1x128xf32> to vector<128x128xf32>
    %40 = arith.cmpf oeq, %8, %39 : vector<128x128xf32>
    %c2147483647_i32 = arith.constant 2147483647 : i32
    %41 = vector.broadcast %c2147483647_i32 : i32 to vector<128x128xi32>
    %42 = arith.select %40, %25, %41 : vector<128x128xi1>, vector<128x128xi32>
    %cst_24 = arith.constant dense<2147483647> : vector<128xi32>
    %43 = vector.multi_reduction <minsi>, %42, %cst_24 [0] : vector<128x128xi32> to vector<128xi32>
    %44 = vector.shape_cast %43 : vector<128xi32> to vector<1x128xi32>
    %c128_i32_25 = arith.constant 128 : i32
    %45 = arith.muli %arg1, %c128_i32_25 : i32
    %46 = vector.broadcast %45 : i32 to vector<1x128xi32>
    %47 = arith.addi %44, %46 : vector<1x128xi32>
    %48 = arith.cmpf ogt, %10, %11 : vector<1x128xf32>
    %c0_26 = arith.constant 0 : index
    %c0_27 = arith.constant 0 : index
    %49 = vector.load %arg11[%c0_26, %c0_27] : memref<1x128xi32, #tpu.memory_space<vmem>>, vector<1x128xi32>
    %50 = arith.select %48, %47, %49 : vector<1x128xi1>, vector<1x128xi32>
    %c0_28 = arith.constant 0 : index
    %c0_29 = arith.constant 0 : index
    %51 = vector.load %arg11[%c0_28, %c0_29] : memref<1x128xi32, #tpu.memory_space<vmem>>, vector<1x128xi32>
    tpu.vector_store %arg11[%c0_28, %c0_29], %50 {strides = array<i32>} : memref<1x128xi32, #tpu.memory_space<vmem>>, vector<1x128xi32>,
    %c0_i32_30 = arith.constant 0 : i32
    %52 = arith.cmpi eq, %arg1, %c0_i32_30 : i32
    %53 = arith.extui %52 : i1 to i32
    %c0_i32_31 = arith.constant 0 : i32
    %54 = arith.cmpi ne, %53, %c0_i32_31 : i32
    scf.if %54 {
      %c0_32 = arith.constant 0 : index
      %c0_33 = arith.constant 0 : index
      %55 = vector.load %arg8[%c0_32, %c0_33] : memref<1x128xf32, #tpu.memory_space<vmem>>, vector<1x128xf32>
      %c0_34 = arith.constant 0 : index
      %c0_35 = arith.constant 0 : index
      %56 = vector.load %arg9[%c0_34, %c0_35] : memref<1x128xf32, #tpu.memory_space<vmem>>, vector<1x128xf32>
      %57 = math.log %56 : vector<1x128xf32>
      %58 = arith.addf %55, %57 : vector<1x128xf32>
      %c0_36 = arith.constant 0 : index
      %c0_37 = arith.constant 0 : index
      %59 = vector.load %arg10[%c0_36, %c0_37] : memref<1x128xf32, #tpu.memory_space<vmem>>, vector<1x128xf32>
      %60 = arith.subf %58, %59 : vector<1x128xf32>
      %c0_38 = arith.constant 0 : index
      %c0_39 = arith.constant 0 : index
      %61 = vector.load %arg6[%c0_38, %c0_39] : memref<1x128xf32, #tpu.memory_space<vmem>>, vector<1x128xf32>
      tpu.vector_store %arg6[%c0_38, %c0_39], %60 {strides = array<i32>} : memref<1x128xf32, #tpu.memory_space<vmem>>, vector<1x128xf32>,
      %c0_40 = arith.constant 0 : index
      %c0_41 = arith.constant 0 : index
      %62 = vector.load %arg11[%c0_40, %c0_41] : memref<1x128xi32, #tpu.memory_space<vmem>>, vector<1x128xi32>
      %c0_42 = arith.constant 0 : index
      %c0_43 = arith.constant 0 : index
      %63 = vector.load %arg7[%c0_42, %c0_43] : memref<1x128xi32, #tpu.memory_space<vmem>>, vector<1x128xi32>
      tpu.vector_store %arg7[%c0_42, %c0_43], %62 {strides = array<i32>} : memref<1x128xi32, #tpu.memory_space<vmem>>, vector<1x128xi32>,
    } else {
    }
    return
  }
  func.func @transform_0(%arg0: i32, %arg1: i32) -> (i32, i32) {
    %c0_i32 = arith.constant 0 : i32
    %c0_i32_0 = arith.constant 0 : i32
    return %c0_i32, %arg0 : i32, i32
  }
  func.func @transform_1(%arg0: i32, %arg1: i32) -> (i32, i32) {
    %c0_i32 = arith.constant 0 : i32
    %c0_i32_0 = arith.constant 0 : i32
    return %arg1, %c0_i32 : i32, i32
  }
  func.func @transform_2(%arg0: i32, %arg1: i32) -> (i32, i32) {
    %c0_i32 = arith.constant 0 : i32
    %c0_i32_0 = arith.constant 0 : i32
    return %arg1, %c0_i32 : i32, i32
  }
  func.func @transform_3(%arg0: i32, %arg1: i32) -> (i32, i32) {
    %c0_i32 = arith.constant 0 : i32
    %c0_i32_0 = arith.constant 0 : i32
    return %c0_i32, %arg0 : i32, i32
  }
  func.func @transform_4(%arg0: i32, %arg1: i32) -> (i32, i32) {
    %c0_i32 = arith.constant 0 : i32
    %c0_i32_0 = arith.constant 0 : i32
    return %c0_i32, %arg0 : i32, i32
  }
  func.func @transform_5(%arg0: i32, %arg1: i32) -> (i32, i32) {
    %c0_i32 = arith.constant 0 : i32
    %c0_i32_0 = arith.constant 0 : i32
    return %c0_i32, %arg0 : i32, i32
  }
}

</mosaic_0001>

<bundles_post_ra>
// kernel: tpu_custom_call.1
= control target key start
LH: loop header
LB: loop body
LE: loop exit
PB: predicated region body
PF: predicated region fallthrough
CT: control target
= control target key end

     0   :  { %11 = vsyncpa [#allocation7], 0  ;;  %vm198_vm0 = vcmask 261120   ;;  %v778_v3 = vmov 0   ;;  %s1252_s0 = inlined_call_operand.vmem [shape: bf16[32,128], index: 0, kind: input, shape index: {}]   ;;  %s1253_s1 = inlined_call_operand.vmem [shape: bf16[128,32], index: 1, kind: input, shape index: {}]   ;;  %s1254_s2 = inlined_call_operand.vmem [shape: f32[128,1], index: 2, kind: input, shape index: {}]   ;;  %s1255_s3 = inlined_call_operand.vmem [shape: s32[1,128], index: 3, kind: input, shape index: {}]   ;;  %s1256_s4 = inlined_call_operand.hbm [shape: f32[1,128], index: 4, kind: output, shape index: {0}]   ;;  %s1257_s5 = inlined_call_operand.hbm [shape: s32[1,128], index: 5, kind: output, shape index: {1}]  }
   0x1   :  { %v684_v0 = vld [vmem:[%s1252_s0] sm:$0xff]   ;;  %v685_v1 = vld [vmem:[%s1252_s0 + $0x8] sm:$0xff]   ;;  %29 = vst [vmem:[#allocation5] sm:$0x1] %v778_v3  ;;  %v690_v7 = vld [vmem:[%s1253_s1 + $0x10] sm:$0xff]   ;;  %683 = vset.pattern.permute.xlu1 %v778_v3  ;;  %682 = vset.pattern.permute.xlu0 %v778_v3 }
   0x2   :  { %653 = vmatprep.subr.bf16.mxu0 %v684_v0  ;;  %673 = vmatprep.subr.bf16.mxu1 %v684_v0  ;;  %v686_v2 = vld [vmem:[%s1253_s1] sm:$0xff]   ;;  %v688_v5 = vld [vmem:[%s1253_s1 + $0x8] sm:$0xff]   ;;  %v691_v8 = vld [vmem:[%s1253_s1 + $0x30] sm:$0xff]  }
   0x3   :  { %654 = vmatpush3.bf16.msra.mxu0 %v684_v0  ;;  %675 = vmatpush3.bf16.msra.mxu1 %v684_v0  ;;  %v687_v4 = vld [vmem:[%s1253_s1 + $0x20] sm:$0xff]   ;;  %v689_v6 = vld [vmem:[%s1253_s1 + $0x28] sm:$0xff]   ;;  %v52_v9 = vld [vmem:[%s1254_s2 + $0x10] sm:$0xff] }
   0x4   :  { %655 = vmatprep.subr.bf16.mxu0 %v685_v1  ;;  %674 = vmatprep.subr.bf16.mxu1 %v685_v1  ;;  %v50_v10 = vld [vmem:[%s1254_s2] sm:$0xff]  ;;  %v53_v11 = vld [vmem:[%s1254_s2 + $0x18] sm:$0xff]  ;;  %v51_v12 = vld [vmem:[%s1254_s2 + $0x8] sm:$0xff] }
   0x5   :  { %657 = vmatprep.mubr.msk.bf16.mxu0 %vm198_vm0, %v686_v2  ;;  %665 = vmatprep.mubr.msk.bf16.mxu1 %vm198_vm0, %v687_v4  ;;  %v692_v13 = vld [vmem:[%s1253_s1 + $0x18] sm:$0xff]  }
   0x6   :  { %78 = vperm.xlu1 %683, %v52_v9   ;;  %68 = vperm.xlu0 %682, %v50_v10   ;;  %v693_v14 = vld [vmem:[%s1253_s1 + $0x38] sm:$0xff]  }
   0x7   :  { %656 = vmatpush3.bf16.msra.mxu0 %v685_v1  ;;  %676 = vmatpush3.bf16.msra.mxu1 %v685_v1 }
   0xa   :  { %658 = vmatmul.mubr.msk.bf16.vlgmr.msra.gmra.mrb[0].mxu0 %vm198_vm0, %v688_v5  ;;  %666 = vmatmul.mubr.msk.bf16.vlgmr.msra.gmra.mrb[0].mxu1 %vm198_vm0, %v689_v6 }
   0xb   :  { %661 = vmatprep.mubr.msk.bf16.mxu0 %vm198_vm0, %v690_v7  ;;  %669 = vmatprep.mubr.msk.bf16.mxu1 %vm198_vm0, %v691_v8 }
   0xc   :  { %12 = vsyncpa [#allocation9], 0  ;;  %83 = vperm.xlu1 %683, %v53_v11   ;;  %73 = vperm.xlu0 %682, %v51_v12   ;;  %v55_v15 = vld [vmem:[%s1254_s2 + $0x28] sm:$0xff]  ;;  %v54_v16 = vld [vmem:[%s1254_s2 + $0x20] sm:$0xff]  ;;  %v779_v27 = vmov -1e+30   ;;  %v349_v39 = vlaneseq }
   0xd   :  { %v57_v17 = vld [vmem:[%s1254_s2 + $0x38] sm:$0xff]  ;;  %v56_v18 = vld [vmem:[%s1254_s2 + $0x30] sm:$0xff]  ;;  %v59_v19 = vld [vmem:[%s1254_s2 + $0x48] sm:$0xff]  ;;  %26 = vst [vmem:[#allocation2] sm:$0x1] %v779_v27  ;;  %v780_v28 = vmov 0.0  }
   0xe   :  { %v58_v20 = vld [vmem:[%s1254_s2 + $0x40] sm:$0xff]  ;;  %v61_v21 = vld [vmem:[%s1254_s2 + $0x58] sm:$0xff]  ;;  %v60_v22 = vld [vmem:[%s1254_s2 + $0x50] sm:$0xff]  ;;  %27 = vst [vmem:[#allocation3] sm:$0x1] %v780_v28  ;;  %v905_v40 = vshrl.u32 %v349_v39, 7 }
   0xf   :  { %v63_v23 = vld [vmem:[%s1254_s2 + $0x68] sm:$0xff]  ;;  %v62_v24 = vld [vmem:[%s1254_s2 + $0x60] sm:$0xff]  ;;  %v65_v25 = vld [vmem:[%s1254_s2 + $0x78] sm:$0xff]  ;;  %28 = vst [vmem:[#allocation4] sm:$0x1] %v780_v28 }
  0x10   :  { %93 = vperm.xlu1 %683, %v55_v15   ;;  %88 = vperm.xlu0 %682, %v54_v16   ;;  %v64_v26 = vld [vmem:[%s1254_s2 + $0x70] sm:$0xff]  ;;  %v908_v43 = vadd.s32 8, %v905_v40  ;;  %v913_v45 = vld [vmem:[%s1255_s3] ss:$0 sm:$0xff]  ;;  %v916_v47 = vadd.s32 16, %v905_v40  ;;  %v923_v53 = vadd.s32 24, %v905_v40 }
  0x11   :  { %vm452_vm1 = vcmp.eq.s32.totalorder %v905_v40, %v913_v45  ;;  %v934_v58 = vadd.s32 48, %v905_v40  ;;  %v937_v59 = vadd.s32 32, %v905_v40  ;;  %v944_v0 = vadd.s32 56, %v905_v40  ;;  %s781_s3 = smov [#allocation8]  }
  0x12   :  { %662 = vmatmul.mubr.msk.bf16.gmra.mrb[4].mxu0 %vm198_vm0, %v692_v13  ;;  %670 = vmatmul.mubr.msk.bf16.gmra.mrb[4].mxu1 %vm198_vm0, %v693_v14  ;;  %vm453_vm2 = vcmp.eq.s32.totalorder %v908_v43, %v913_v45  ;;  %vm454_vm3 = vcmp.eq.s32.totalorder %v916_v47, %v913_v45  ;;  %vm455_vm4 = vcmp.eq.s32.totalorder %v923_v53, %v913_v45  ;;  %v949_v3 = vadd.s32 40, %v905_v40  ;;  %s612_s18 = sshll.u32 %s781_s3, 4  ;;  %s613_s18 = int_to_ptr.vmem [resolvable:$true] %s612_s18 }
  0x13   :  { %v953_v5 = vadd.s32 64, %v905_v40  ;;  %v956_v9 = vadd.s32 72, %v905_v40  ;;  %vm456_vm5 = vcmp.eq.s32.totalorder %v937_v59, %v913_v45  ;;  %vm458_vm6 = vcmp.eq.s32.totalorder %v934_v58, %v913_v45  ;;  %s730_s19 = scalar_lea.vmem %s613_s18, 16  ;;  %s734_s20 = scalar_lea.vmem %s613_s18, 32 }
  0x14   :  { %103 = vperm.xlu1 %683, %v57_v17   ;;  %98 = vperm.xlu0 %682, %v56_v18   ;;  %vm459_vm7 = vcmp.eq.s32.totalorder %v944_v0, %v913_v45  ;;  %vm457_vm8 = vcmp.eq.s32.totalorder %v949_v3, %v913_v45  ;;  %p731_p0 = scmp.ne.s32.totalorder %s613_s18, %s730_s19  ;;  %p735_p1 = scmp.lt.s32.totalorder %s613_s18, %s613_s18 }
  0x15   :  { %vm460_vm9 = vcmp.eq.s32.totalorder %v953_v5, %v913_v45  ;;  %vm461_vm10 = vcmp.eq.s32.totalorder %v956_v9, %v913_v45  ;;  %p736_p2 = scmp.lt.s32.totalorder %s734_s20, %s730_s19 }
  0x17   :  { %p737_p3 = por %p736_p2, %p735_p1 }
  0x18   :  { %113 = vperm.xlu1 %683, %v59_v19   ;;  %108 = vperm.xlu0 %682, %v58_v20  }
  0x19   :  { %p738_p4 = pnand %p737_p3, %p731_p0 }
  0x1c   :  { %123 = vperm.xlu1 %683, %v61_v21   ;;  %118 = vperm.xlu0 %682, %v60_v22  }
  0x20   :  { %133 = vperm.xlu1 %683, %v63_v23   ;;  %128 = vperm.xlu0 %682, %v62_v24  }
  0x24   :  { %143 = vperm.xlu1 %683, %v65_v25   ;;  %138 = vperm.xlu0 %682, %v64_v26  }
  0x85   :  { %v79_v29 = vpop.permute.xlu1 %78  ;;  %v69_v30 = vpop.permute.xlu0 %68 }
  0x8b   :  { %v84_v31 = vpop.permute.xlu1 %83  ;;  %v74_v32 = vpop.permute.xlu0 %73 }
  0x8f   :  { %v899_v33 = vpop.permute.xlu1 %93  ;;  %v89_v34 = vpop.permute.xlu0 %88 }
  0x93   :  { %v901_v35 = vpop.permute.xlu1 %103  ;;  %v99_v36 = vpop.permute.xlu0 %98 }
  0x97   :  { %v903_v37 = vpop.permute.xlu1 %113  ;;  %v109_v38 = vpop.permute.xlu0 %108 }
  0x9b   :  { %v124_v41 = vpop.permute.xlu1 %123  ;;  %v119_v42 = vpop.permute.xlu0 %118 }
  0x9f   :  { %v129_v60 = vpop.permute.xlu0 %128  ;;  %v134_v1 = vpop.permute.xlu1 %133 }
  0xa3   :  { %v139_v22 = vpop.permute.xlu0 %138 }
  0xdd   :  { %v659_v44 = vpop.f32.mrb[0].mxu0  ;;  %v667_v46 = vpop.f32.mrb[0].mxu1 }
  0xde   :  { %v257_v48 = vpop.f32.mrb[1].mxu0  ;;  %v289_v49 = vpop.f32.mrb[1].mxu1  ;;  %v927_v56 = vadd.f32 %v659_v44, %v79_v29  ;;  %v969_v17 = vadd.f32 %v667_v46, %v119_v42 }
  0xdf   :  { %v918_v50 = vadd.f32 %v257_v48, %v69_v30  ;;  %v660_v51 = vpop.f32.mrb[2].mxu0  ;;  %v668_v52 = vpop.f32.mrb[2].mxu1  ;;  %v975_v23 = vadd.f32 %v289_v49, %v109_v38 }
  0xe0   :  { %v260_v54 = vpop.f32.mrb[3].mxu0  ;;  %v292_v55 = vpop.f32.mrb[3].mxu1  ;;  %v940_v62 = vadd.f32 %v660_v51, %v84_v31  ;;  %v470_v4 = vsel %vm454_vm3, %v927_v56, 0.0  ;;  %v992_v31 = vadd.f32 %v668_v52, %v124_v41  ;;  %v1021_v52 = vadd.s32 80, %v905_v40 }
  0xe1   :  { %v929_v57 = vadd.f32 %v260_v54, %v74_v32  ;;  %v468_v61 = vsel %vm452_vm1, %v918_v50, 0.0  ;;  %v144_v38 = vpop.permute.xlu1 %143 }
  0xe2   :  { %v471_v13 = vsel %vm455_vm4, %v940_v62, 0.0  ;;  %vm462_vm11 = vcmp.eq.s32.totalorder %v1021_v52, %v913_v45 }
  0xe3   :  { %v469_v63 = vsel %vm453_vm2, %v929_v57, 0.0 }
  0xe4   :  { %v484_v2 = vadd.f32 %v469_v63, %v468_v61  ;;  %v1032_v63 = vadd.s32 88, %v905_v40 }
  0xe5   :  { %v663_v6 = vpop.f32.mrb[4].mxu0  ;;  %v671_v7 = vpop.f32.mrb[4].mxu1 }
  0xe6   :  { %v485_v8 = vadd.f32 %v484_v2, %v470_v4  ;;  %v958_v10 = vadd.f32 %v663_v6, %v99_v36  ;;  %v273_v11 = vpop.f32.mrb[5].mxu0  ;;  %v305_v12 = vpop.f32.mrb[5].mxu1  ;;  %v986_v27 = vadd.f32 %v671_v7, %v139_v22  ;;  %v476_v4 = vsel %vm460_vm9, %v975_v23, 0.0 }
  0xe7   :  { %v965_v14 = vadd.f32 %v273_v11, %v89_v34  ;;  %v664_v15 = vpop.f32.mrb[6].mxu0  ;;  %v672_v16 = vpop.f32.mrb[6].mxu1  ;;  %v994_v32 = vadd.f32 %v305_v12, %v129_v60  ;;  %v1040_v7 = vadd.s32 96, %v905_v40  ;;  %vm463_vm12 = vcmp.eq.s32.totalorder %v1032_v63, %v913_v45 }
  0xe8   :  { %v322_v18 = vmax.f32 %v927_v56, %v958_v10  ;;  %v486_v19 = vadd.f32 %v485_v8, %v471_v13  ;;  %v276_v20 = vpop.f32.mrb[7].mxu0  ;;  %v308_v21 = vpop.f32.mrb[7].mxu1  ;;  %v984_v26 = vadd.f32 %v664_v15, %v901_v35  ;;  %v1000_v35 = vadd.f32 %v292_v55, %v903_v37 }
  0xe9   :  { %v320_v24 = vmax.f32 %v918_v50, %v965_v14  ;;  %v472_v25 = vsel %vm456_vm5, %v965_v14, 0.0  ;;  %v990_v30 = vadd.f32 %v276_v20, %v899_v33  ;;  %v1010_v44 = vadd.f32 %v672_v16, %v144_v38 }
  0xea   :  { %v326_v28 = vmax.f32 %v322_v18, %v969_v17  ;;  %v487_v29 = vadd.f32 %v486_v19, %v472_v25  ;;  %v323_v36 = vmax.f32 %v940_v62, %v984_v26  ;;  %v474_v37 = vsel %vm458_vm6, %v958_v10, 0.0 }
  0xeb   :  { %v324_v34 = vmax.f32 %v320_v24, %v975_v23  ;;  %v321_v42 = vmax.f32 %v929_v57, %v990_v30  ;;  %v473_v33 = vsel %vm457_vm8, %v990_v30, 0.0  ;;  %v1017_v49 = vadd.f32 %v308_v21, %v134_v1 }
  0xec   :  { %v330_v39 = vmax.f32 %v326_v28, %v986_v27  ;;  %v327_v46 = vmax.f32 %v323_v36, %v992_v31  ;;  %v488_v48 = vadd.f32 %v487_v29, %v473_v33  ;;  %v475_v60 = vsel %vm459_vm7, %v984_v26, 0.0 }
  0xed   :  { %v328_v41 = vmax.f32 %v324_v34, %v994_v32  ;;  %v325_v51 = vmax.f32 %v321_v42, %v1000_v35  ;;  %v477_v11 = vsel %vm461_vm10, %v1000_v35, 0.0  ;;  %v1046_v13 = vadd.s32 104, %v905_v40 }
  0xee   :  { %v331_v54 = vmax.f32 %v327_v46, %v1010_v44  ;;  %v489_v55 = vadd.f32 %v488_v48, %v474_v37  ;;  %v478_v16 = vsel %vm462_vm11, %v969_v17, 0.0  ;;  %v1050_v19 = vadd.s32 112, %v905_v40 }
  0xef   :  { %v329_v61 = vmax.f32 %v325_v51, %v1017_v49  ;;  %vm464_vm13 = vcmp.eq.s32.totalorder %v1040_v7, %v913_v45  ;;  %v479_v21 = vsel %vm463_vm12, %v992_v31, 0.0  ;;  %v1056_v24 = vadd.s32 120, %v905_v40 }
  0xf0   :  { %v333_v1 = vmax.f32 %v330_v39, %v331_v54  ;;  %v490_v2 = vadd.f32 %v489_v55, %v475_v60  ;;  %vm465_vm14 = vcmp.eq.s32.totalorder %v1046_v13, %v913_v45  ;;  %v480_v28 = vsel %vm464_vm13, %v994_v32, 0.0 }
  0xf1   :  { %v332_v6 = vmax.f32 %v328_v41, %v329_v61  ;;  %vm466_vm15 = vcmp.eq.s32.totalorder %v1050_v19, %v913_v45  ;;  %v481_v38 = vsel %vm465_vm14, %v1017_v49, 0.0  ;;  %vm467_vm0 = vcmp.eq.s32.totalorder %v1056_v24, %v913_v45  ;;  %v1067_v41 = vld [vmem:[#allocation2] sm:$0x1] }
  0xf2   :  { %v491_v8 = vadd.f32 %v490_v2, %v476_v4  ;;  %v482_v42 = vsel %vm466_vm15, %v986_v27, 0.0  ;;  %v483_v48 = vsel %vm467_vm0, %v1010_v44, 0.0  ;;  %v351_v51 = vsub.s32 0, %v905_v40 }
  0xf3   :  { %v334_v12 = vmax.f32 %v332_v6, %v333_v1 }
  0xf4   :  { %v492_v15 = vadd.f32 %v491_v8, %v477_v11 }
  0xf5   :  { %v335_v18 = vrot.slane %v334_v12, 4 }
  0xf6   :  { %v493_v20 = vadd.f32 %v492_v15, %v478_v16 }
  0xf7   :  { %v336_v22 = vmax.f32 %v334_v12, %v335_v18 }
  0xf8   :  { %v494_v25 = vadd.f32 %v493_v20, %v479_v21 }
  0xf9   :  { %v337_v29 = vrot.slane %v336_v22, 2 }
  0xfa   :  { %v495_v34 = vadd.f32 %v494_v25, %v480_v28 }
  0xfb   :  { %v338_v36 = vmax.f32 %v336_v22, %v337_v29 }
  0xfc   :  { %v496_v39 = vadd.f32 %v495_v34, %v481_v38 }
  0xfd   :  { %v339_v33 = vrot.slane %v338_v36, 1 }
  0xfe   :  { %v497_v46 = vadd.f32 %v496_v39, %v482_v42 }
  0xff   :  { %v1070_v37 = vmax.f32 %v338_v36, %v339_v33 }
 0x100   :  { %v498_v54 = vadd.f32 %v497_v46, %v483_v48 }
 0x101   :  { %v1075_v55 = vmax.f32 %v1067_v41, %v1070_v37  ;;  %vm507_vm1 = vcmp.eq.f32.partialorder %v918_v50, %v1070_v37  ;;  %vm508_vm2 = vcmp.eq.f32.partialorder %v929_v57, %v1070_v37  ;;  %vm509_vm3 = vcmp.eq.f32.partialorder %v927_v56, %v1070_v37 }
 0x102   :  { %vm510_vm4 = vcmp.eq.f32.partialorder %v940_v62, %v1070_v37  ;;  %vm511_vm5 = vcmp.eq.f32.partialorder %v965_v14, %v1070_v37  ;;  %vm512_vm6 = vcmp.eq.f32.partialorder %v990_v30, %v1070_v37  ;;  %vm513_vm7 = vcmp.eq.f32.partialorder %v958_v10, %v1070_v37 }
 0x103   :  { %v1090_v45 = vrot.slane %v1075_v55, %v351_v51  ;;  %425 = vst [vmem:[#allocation2] sm:$0x1] %v1075_v55  ;;  %vm514_vm8 = vcmp.eq.f32.partialorder %v984_v26, %v1070_v37  ;;  %vm515_vm9 = vcmp.eq.f32.partialorder %v975_v23, %v1070_v37  ;;  %vm516_vm10 = vcmp.eq.f32.partialorder %v1000_v35, %v1070_v37 }
 0x104   :  { %vm517_vm11 = vcmp.eq.f32.partialorder %v969_v17, %v1070_v37  ;;  %v499_v2 = vrot.slane %v498_v54, 4  ;;  %vm518_vm12 = vcmp.eq.f32.partialorder %v992_v31, %v1070_v37  ;;  %vm519_vm13 = vcmp.eq.f32.partialorder %v994_v32, %v1070_v37 }
 0x105   :  { %v354_v60 = vsub.f32 %v918_v50, %v1090_v45  ;;  %v355_v61 = vsub.f32 %v929_v57, %v1090_v45  ;;  %v356_v1 = vsub.f32 %v927_v56, %v1090_v45  ;;  %v357_v4 = vsub.f32 %v940_v62, %v1090_v45 }
 0x106   :  { %v358_v6 = vsub.f32 %v965_v14, %v1090_v45  ;;  %v359_v8 = vsub.f32 %v990_v30, %v1090_v45  ;;  %v360_v11 = vsub.f32 %v958_v10, %v1090_v45  ;;  %v361_v12 = vsub.f32 %v984_v26, %v1090_v45 }
 0x107   :  { %v362_v15 = vsub.f32 %v975_v23, %v1090_v45  ;;  %v363_v16 = vsub.f32 %v1000_v35, %v1090_v45  ;;  %v364_v18 = vsub.f32 %v969_v17, %v1090_v45  ;;  %v365_v20 = vsub.f32 %v992_v31, %v1090_v45 }
 0x108   :  { %v366_v21 = vsub.f32 %v994_v32, %v1090_v45  ;;  %v367_v22 = vsub.f32 %v1017_v49, %v1090_v45  ;;  %v368_v25 = vsub.f32 %v986_v27, %v1090_v45  ;;  %v369_v28 = vsub.f32 %v1010_v44, %v1090_v45 }
 0x109   :  { %v370_v29 = vmul.f32 1.442695, %v354_v60  ;;  %v372_v34 = vmul.f32 1.442695, %v355_v61  ;;  %v374_v36 = vmul.f32 1.442695, %v356_v1  ;;  %v500_v38 = vadd.f32 %v499_v2, %v498_v54 }
 0x10a   :  { %v376_v39 = vmul.f32 1.442695, %v357_v4  ;;  %v378_v42 = vmul.f32 1.442695, %v358_v6  ;;  %v380_v33 = vmul.f32 1.442695, %v359_v8  ;;  %vm520_vm14 = vcmp.eq.f32.partialorder %v1017_v49, %v1070_v37 }
 0x10b   :  { %694 = vpow2.f32 %v370_v29  ;;  %v382_v46 = vmul.f32 1.442695, %v360_v11  ;;  %v384_v48 = vmul.f32 1.442695, %v361_v12  ;;  %v501_v51 = vrot.slane %v500_v38, 2 }
 0x10c   :  { %696 = vpow2.f32 %v372_v34  ;;  %vm521_vm15 = vcmp.eq.f32.partialorder %v986_v27, %v1070_v37  ;;  %v386_v54 = vmul.f32 1.442695, %v362_v15  ;;  %vm522_vm0 = vcmp.eq.f32.partialorder %v1010_v44, %v1070_v37  ;;  %v447_v2 = vld [vmem:[#allocation4] sm:$0x1] }
 0x10d   :  { %698 = vpow2.f32 %v374_v36  ;;  %v502_v60 = vadd.f32 %v501_v51, %v500_v38  ;;  %v388_v61 = vmul.f32 1.442695, %v363_v16  ;;  %v390_v1 = vmul.f32 1.442695, %v364_v18 }
 0x10e   :  { %700 = vpow2.f32 %v376_v39  ;;  %v1145_v4 = vmul.f32 1.442695, %v365_v20  ;;  %v1147_v6 = vmul.f32 1.442695, %v366_v21  ;;  %v523_v11 = vsel %vm507_vm1, %v905_v40, 2147483647 }
 0x10f   :  { %702 = vpow2.f32 %v378_v42  ;;  %v503_v8 = vrot.slane %v502_v60, 1  ;;  %v524_v12 = vsel %vm508_vm2, %v908_v43, 2147483647  ;;  %v525_v15 = vsel %vm509_vm3, %v916_v47, 2147483647 }
 0x110   :  { %704 = vpow2.f32 %v380_v33  ;;  %v526_v18 = vsel %vm510_vm4, %v923_v53, 2147483647  ;;  %v527_v40 = vsel %vm511_vm5, %v937_v59, 2147483647  ;;  %v528_v43 = vsel %vm512_vm6, %v949_v3, 2147483647 }
 0x111   :  { %706 = vpow2.f32 %v382_v46  ;;  %v504_v16 = vadd.f32 %v503_v8, %v502_v60  ;;  %v529_v47 = vsel %vm513_vm7, %v934_v58, 2147483647  ;;  %v530_v53 = vsel %vm514_vm8, %v944_v0, 2147483647 }
 0x112   :  { %708 = vpow2.f32 %v384_v48  ;;  %v531_v59 = vsel %vm515_vm9, %v953_v5, 2147483647  ;;  %v532_v62 = vsel %vm516_vm10, %v956_v9, 2147483647  ;;  %v533_v58 = vsel %vm517_vm11, %v1021_v52, 2147483647 }
 0x113   :  { %710 = vpow2.f32 %v386_v54  ;;  %v505_v57 = vadd.f32 %v504_v16, %v447_v2  ;;  %v534_v0 = vsel %vm518_vm12, %v1032_v63, 2147483647  ;;  %v535_v5 = vsel %vm519_vm13, %v1040_v7, 2147483647 }
 0x114   :  { %712 = vpow2.f32 %v388_v61  ;;  %vm539_vm1 = vcmp.lt.s32.totalorder %v523_v11, %v527_v40  ;;  %v536_v9 = vsel %vm520_vm14, %v1046_v13, 2147483647  ;;  %vm541_vm2 = vcmp.lt.s32.totalorder %v524_v12, %v528_v43 }
 0x115   :  { %v695_v50 = vpop.eup %694  ;;  %506 = vst [vmem:[#allocation4] sm:$0x1] %v505_v57  ;;  %v540_v14 = vsel %vm539_vm1, %v523_v11, %v527_v40  ;;  %vm543_vm3 = vcmp.lt.s32.totalorder %v525_v15, %v529_v47  ;;  %v537_v26 = vsel %vm521_vm15, %v1050_v19, 2147483647  ;;  %v542_v30 = vsel %vm541_vm2, %v524_v12, %v528_v43 }
 0x116   :  { %v697_v56 = vpop.eup %696  ;;  %v544_v31 = vsel %vm543_vm3, %v525_v15, %v529_v47  ;;  %v538_v35 = vsel %vm522_vm0, %v1056_v24, 2147483647  ;;  %vm545_vm4 = vcmp.lt.s32.totalorder %v526_v18, %v530_v53  ;;  %vm547_vm5 = vcmp.lt.s32.totalorder %v540_v14, %v531_v59 }
 0x117   :  { %v402_v3 = vadd.f32 %v697_v56, %v695_v50  ;;  %v699_v10 = vpop.eup %698  ;;  %vm549_vm6 = vcmp.lt.s32.totalorder %v542_v30, %v532_v62  ;;  %v546_v7 = vsel %vm545_vm4, %v526_v18, %v530_v53  ;;  %v548_v13 = vsel %vm547_vm5, %v540_v14, %v531_v59 }
 0x118   :  { %v701_v17 = vpop.eup %700  ;;  %v550_v20 = vsel %vm549_vm6, %v542_v30, %v532_v62  ;;  %vm551_vm7 = vcmp.lt.s32.totalorder %v544_v31, %v533_v58  ;;  %vm553_vm8 = vcmp.lt.s32.totalorder %v546_v7, %v534_v0  ;;  %vm555_vm9 = vcmp.lt.s32.totalorder %v548_v13, %v535_v5 }
 0x119   :  { %v403_v23 = vadd.f32 %v699_v10, %v402_v3  ;;  %v703_v32 = vpop.eup %702  ;;  %vm557_vm10 = vcmp.lt.s32.totalorder %v550_v20, %v536_v9  ;;  %v552_v34 = vsel %vm551_vm7, %v544_v31, %v533_v58  ;;  %v554_v36 = vsel %vm553_vm8, %v546_v7, %v534_v0 }
 0x11a   :  { %v705_v52 = vpop.eup %704  ;;  %v556_v38 = vsel %vm555_vm9, %v548_v13, %v535_v5  ;;  %714 = vpow2.f32 %v390_v1  ;;  %v558_v24 = vsel %vm557_vm10, %v550_v20, %v536_v9  ;;  %vm559_vm11 = vcmp.lt.s32.totalorder %v552_v34, %v537_v26 }
 0x11b   :  { %v404_v63 = vadd.f32 %v701_v17, %v403_v23  ;;  %v707_v21 = vpop.eup %706  ;;  %vm561_vm12 = vcmp.lt.s32.totalorder %v554_v36, %v538_v35  ;;  %v560_v46 = vsel %vm559_vm11, %v552_v34, %v537_v26  ;;  %vm563_vm13 = vcmp.lt.s32.totalorder %v556_v38, %v558_v24 }
 0x11c   :  { %v709_v19 = vpop.eup %708  ;;  %v562_v48 = vsel %vm561_vm12, %v554_v36, %v538_v35  ;;  %716 = vpow2.f32 %v1145_v4  ;;  %v396_v51 = vmul.f32 1.442695, %v367_v22  ;;  %v564_v54 = vsel %vm563_vm13, %v556_v38, %v558_v24 }
 0x11d   :  { %v405_v29 = vadd.f32 %v703_v32, %v404_v63  ;;  %v711_v39 = vpop.eup %710  ;;  %vm565_vm14 = vcmp.lt.s32.totalorder %v560_v46, %v562_v48  ;;  %718 = vpow2.f32 %v1147_v6  ;;  %v398_v1 = vmul.f32 1.442695, %v368_v25 }
 0x11e   :  { %v713_v42 = vpop.eup %712  ;;  %v566_v61 = vsel %vm565_vm14, %v560_v46, %v562_v48  ;;  %720 = vpow2.f32 %v396_v51  ;;  %v400_v4 = vmul.f32 1.442695, %v369_v28  ;;  %v344_v25 = vsub.f32 %v1067_v41, %v1075_v55  ;;  %v580_v28 = vld [vmem:[#allocation5] sm:$0x1] }
 0x11f   :  { %v406_v33 = vadd.f32 %v705_v52, %v405_v29  ;;  %vm567_vm15 = vcmp.lt.s32.totalorder %v564_v54, %v566_v61  ;;  %722 = vpow2.f32 %v398_v1  ;;  %vm579_vm3 = vcmp.gt.f32.partialorder %v1070_v37, %v1067_v41 }
 0x120   :  { %v568_v8 = vsel %vm567_vm15, %v564_v54, %v566_v61  ;;  %724 = vpow2.f32 %v400_v4  ;;  %v345_v47 = vmul.f32 1.442695, %v344_v25 }
 0x121   :  { %v407_v60 = vadd.f32 %v707_v21, %v406_v33  ;;  %v569_v49 = vrot.slane %v568_v8, 4 }
 0x122   :  { %726 = vpow2.f32 %v345_v47 }
 0x123   :  { %v408_v2 = vadd.f32 %v709_v19, %v407_v60  ;;  %vm570_vm0 = vcmp.lt.s32.totalorder %v568_v8, %v569_v49 }
 0x124   :  { %v571_v12 = vsel %vm570_vm0, %v568_v8, %v569_v49  ;;  %v715_v15 = vpop.eup %714 }
 0x125   :  { %v409_v22 = vadd.f32 %v711_v39, %v408_v2  ;;  %v572_v6 = vrot.slane %v571_v12, 2 }
 0x126   :  { %v717_v27 = vpop.eup %716 }
 0x127   :  { %v410_v11 = vadd.f32 %v713_v42, %v409_v22  ;;  %vm573_vm1 = vcmp.lt.s32.totalorder %v571_v12, %v572_v6  ;;  %v719_v50 = vpop.eup %718 }
 0x128   :  { %v574_v40 = vsel %vm573_vm1, %v571_v12, %v572_v6  ;;  %v721_v43 = vpop.eup %720 }
 0x129   :  { %v411_v16 = vadd.f32 %v715_v15, %v410_v11  ;;  %v575_v44 = vrot.slane %v574_v40, 1  ;;  %v723_v57 = vpop.eup %722 }
 0x12a   :  { %v725_v55 = vpop.eup %724 }
 0x12b   :  { %v412_v18 = vadd.f32 %v717_v27, %v411_v16  ;;  %vm576_vm2 = vcmp.lt.s32.totalorder %v574_v40, %v575_v44 }
 0x12c   :  { %v577_v56 = vsel %vm576_vm2, %v574_v40, %v575_v44 }
 0x12d   :  { %v413_v45 = vadd.f32 %v719_v50, %v412_v18  ;;  %v581_v59 = vsel %vm579_vm3, %v577_v56, %v580_v28 }
 0x12e   :  { %582 = vst [vmem:[#allocation5] sm:$0x1] %v581_v59 }
 0x12f   :  { %v414_v53 = vadd.f32 %v721_v43, %v413_v45 }
 0x131   :  { %v415_v62 = vadd.f32 %v723_v57, %v414_v53 }
 0x133   :  { %v416_v58 = vadd.f32 %v725_v55, %v415_v62 }
 0x135   :  { %v417_v3 = vrot.slane %v416_v58, 4  ;;  %v594_v5 = vld [vmem:[#allocation5] sm:$0x1] }
 0x136   :  { %595 = vst [vmem:[#allocation8] sm:$0x1] %v594_v5 }
 0x137   :  { %v418_v0 = vadd.f32 %v417_v3, %v416_v58 }
 0x139   :  { %v419_v10 = vrot.slane %v418_v0, 2 }
 0x13a   :  { %741 = shalt.err (!%p738_p4)
}
 0x13b   :  { %s742_s23 = scalar_lea.hbm %s1257_s5, 16 }
 0x13c   :  { %p743_p5 = scmp.ne.s32.totalorder %s1257_s5, %s742_s23  ;;  %p746_p6 = scmp.lt.u32.totalorder %s742_s23, %s1257_s5 }
 0x13e   :  { %p748_p7 = pnand %p746_p6, %p743_p5 }
 0x140   :  { %751 = shalt.err (!%p748_p7)
}
 0x141   :  { %615 = dma.vmem_to_hbm [thread:$0]  %s613_s18, 16, %s1257_s5, [#allocation9]   ;;  %v420_v41 = vadd.f32 %v419_v10, %v418_v0  ;;  %v727_v37 = vpop.eup %726  ;;  %v343_v9 = vld [vmem:[#allocation3] sm:$0x1]  ;;  %v586_v35 = vld [vmem:[#allocation2] sm:$0x1] }
 0x142   :  { %v347_v17 = vmul.f32 %v727_v37, %v343_v9  ;;  %s782_s28 = smov [#allocation6]   ;;  %v591_v63 = vld [vmem:[#allocation4] sm:$0x1] }
 0x143   :  { %v421_v14 = vrot.slane %v420_v41, 1  ;;  %s602_s29 = sshll.u32 %s782_s28, 4  ;;  %s603_s29 = int_to_ptr.vmem [resolvable:$true] %s602_s29 }
 0x144   :  { %s752_s5 = scalar_lea.vmem %s603_s29, 16  ;;  %s756_s30 = scalar_lea.vmem %s603_s29, 32 }
 0x145   :  { %v422_v23 = vadd.f32 %v421_v14, %v420_v41  ;;  %p753_p8 = scmp.ne.s32.totalorder %s603_s29, %s752_s5  ;;  %p757_p9 = scmp.lt.s32.totalorder %s603_s29, %s603_s29 }
 0x146   :  { %p758_p10 = scmp.lt.s32.totalorder %s756_s30, %s752_s5 }
 0x147   :  { %v423_v26 = vadd.f32 %v422_v23, %v347_v17 }
 0x148   :  { %p759_p11 = por %p758_p10, %p757_p9 }
 0x149   :  { %424 = vst [vmem:[#allocation3] sm:$0x1] %v423_v26 }
 0x14a   :  { %p760_p12 = pnand %p759_p11, %p753_p8 }
 0x150   :  { %v587_v30 = vld [vmem:[#allocation3] sm:$0x1] }
 0x151   :  { %728 = vlog2.f32 %v587_v30 }
 0x15b   :  { %v729_v31 = vpop.eup %728 }
 0x15c   :  { %v589_v32 = vmul.f32 0.6931472, %v729_v31 }
 0x15e   :  { %v590_v52 = vadd.f32 %v589_v32, %v586_v35 }
 0x160   :  { %v592_v7 = vsub.f32 %v590_v52, %v591_v63 }
 0x162   :  { %593 = vst [vmem:[#allocation6] sm:$0x1] %v592_v7 }
 0x163   :  { %763 = shalt.err (!%p760_p12)
}
 0x164   :  { %s764_s8 = scalar_lea.hbm %s1256_s4, 16 }
 0x165   :  { %p765_p13 = scmp.ne.s32.totalorder %s1256_s4, %s764_s8  ;;  %p768_p0 = scmp.lt.u32.totalorder %s764_s8, %s1256_s4 }
 0x167   :  { %p770_p1 = pnand %p768_p0, %p765_p13 }
 0x169   :  { %773 = shalt.err (!%p770_p1)
}
 0x16a   :  { %605 = dma.vmem_to_hbm [thread:$0]  %s603_s29, 16, %s1256_s4, [#allocation7]  }
 0x16b   :  { %774 = dma.done.wait [#allocation7], 16  }
 0x16c   :  { %775 = vsyncadd [#allocation7], 4294967280 }
 0x16d   :  { %776 = dma.done.wait [#allocation9], 16  }
 0x16e   :  { %777 = vsyncadd [#allocation9], 4294967280 }
 0x16f   :  { %622 = vsyncpa [#allocation7], 1 }
 0x170   :  { %623 = vsyncpa [#allocation9], 1 }

</bundles_post_ra>
